<compile_context>
chip_gen: v6e
topology: v6e:2x2x1
jax: 0.10.0
libtpu: 0.0.40
codegen_flags: <defaults>
</compile_context>

<pallas_src>
import functools

import jax
import jax.numpy as jnp
from jax.experimental import pallas as pl
from jax.experimental.pallas import tpu as pltpu


def _round_up(v, m):
    return ((v + m - 1) // m) * m


def _vmem_capacity_bytes():
    """Per-core VMEM capacity; conservative 64 MiB (v7x) fallback."""
    try:
        info = pltpu.get_tpu_info()
        for name in ("vmem_capacity_bytes", "vmem_size_bytes"):
            cap = getattr(info, name, None)
            if cap:
                return int(cap)
    except Exception:
        pass
    return 64 * 1024 * 1024


def _lane_tile(v, reps):
    """Replicate a (rows, L) value `reps` times along the lane axis.

    Uses ~log2(reps) lane concatenations (pure data moves), no reshapes.
    """
    if reps <= 1:
        return v
    L = v.shape[-1]
    out = v
    built = 1
    while built < reps:
        take = min(built, reps - built)
        out = jnp.concatenate([out, out[:, :take * L]], axis=-1)
        built += take
    return out


# ----------------------------------------------------------------------------
# Pallas kernel (one batch tile per grid step)
# ----------------------------------------------------------------------------
def _kan_kernel(k, in_dim, n_basis, with_aux,
                x_ref, glo_ref, ghi_ref, rec_ref, wyb_ref, *rest):
    f32 = jnp.float32
    I = in_dim
    if with_aux:
        cf_ref, msb_ref, msp_ref, y_ref, post_ref, ps_ref = rest
        OIp = post_ref.shape[1]
    else:
        (y_ref,) = rest

    x = x_ref[...]                                   # (TB, I)
    base = x * jax.nn.sigmoid(x)                     # SiLU residual

    # --- Cox-de Boor recursion, lane-flat layout: (basis g, in_dim i) on the
    # --- lane axis, g-major / i-minor.  Width = (G-1-p)*I at degree p, so the
    # --- VPU stays lane-dense even for small in_dim; the B_{g+1,p-1} term is
    # --- a shifted lane slice.
    W0 = glo_ref.shape[1] // I                       # G - 1 intervals
    xt = _lane_tile(x, W0)                           # (TB, (G-1)*I)
    b = jnp.logical_and(xt >= glo_ref[...], xt < ghi_ref[...]).astype(f32)
    for p in range(1, k + 1):
        w = (W0 - p) * I
        xs = xt[:, :w]
        # left  = (x - t_g) / (t_{g+p} - t_g)        = x*cl + dl
        # right = (t_{g+p+1} - x) / (t_{g+p+1}-t_{g+1}) = x*cr + dr
        left = xs * rec_ref[p - 1, 0:1, :w] + rec_ref[p - 1, 1:2, :w]
        right = xs * rec_ref[p - 1, 2:3, :w] + rec_ref[p - 1, 3:4, :w]
        b = left * b[:, :w] + right * b[:, I:I + w]
    # b: (TB, n_basis*I), b[:, n*I + i] = B_n(x_i)   (n-major, i-minor)

    # --- y: ONE fused MXU contraction over K = (n_basis + 1) * in_dim.
    lhs = jnp.concatenate([base, b], axis=1)         # (TB, (N+1)*I)
    y = jnp.dot(lhs, wyb_ref[...], precision=jax.lax.Precision.HIGHEST,
                preferred_element_type=f32)          # (TB, Op)
    y_ref[...] = y.astype(y_ref.dtype)

    if with_aux:
        # --- postspline / postacts as lane-dense, 128-aligned (TB, OIp) slabs
        # --- in (out_dim-major, in_dim-minor) order == (B, O, I) row-major.
        TB = x.shape[0]
        reps = -(-OIp // I)
        ps = jnp.zeros((TB, OIp), f32)
        for n in range(n_basis):
            chunk = b[:, n * I:(n + 1) * I]                  # (TB, I)
            tiled = _lane_tile(chunk, reps)[:, :OIp]         # b_n over all O blocks
            ps = ps + tiled * cf_ref[n:n + 1, :]             # coef[i, o, n]
        base_t = _lane_tile(base, reps)[:, :OIp]
        post = base_t * msb_ref[...] + msp_ref[...] * ps
        ps_ref[...] = ps.astype(ps_ref.dtype)
        post_ref[...] = post.astype(post_ref.dtype)


# ----------------------------------------------------------------------------
# Wrapper: parameter folding (plain JAX glue) + pallas_call
# ----------------------------------------------------------------------------
def kan_forward(x, grid, coef, scale_base, scale_sp, mask, k,
                block_batch=256, return_aux=True, aux_dtype=jnp.float32):
    B, I = x.shape
    O = coef.shape[1]
    n_basis = coef.shape[2]
    G = grid.shape[1]
    assert G - k - 1 == n_basis, (G, k, n_basis)

    f32 = jnp.float32
    x = x.astype(f32)
    grid = grid.astype(f32)
    coef = coef.astype(f32)
    msb = (mask * scale_base).astype(f32)            # (I, O) mask*scale_base
    msp = (mask * scale_sp).astype(f32)              # (I, O) mask*scale_sp

    OI = O * I
    OIp = _round_up(OI, 128)                         # lane-dense padded widths
    Op = _round_up(O, 128)
    W0 = G - 1
    W0I = W0 * I
    kk = max(k, 1)

    # --- degree-0 knot windows, flattened g-major / i-minor.
    glo0 = grid[:, :-1].T.reshape(1, W0I)            # grid[i, g]
    ghi0 = grid[:, 1:].T.reshape(1, W0I)             # grid[i, g+1]

    # --- recursion constants (reciprocals hoisted; zero denominators -> 0,
    # --- NOT torch.nan_to_num saturation; never hit for uniform extended grids).
    rec = jnp.zeros((kk, 4, W0I), f32)
    for p in range(1, k + 1):
        W = G - 1 - p
        t_lo = grid[:, 0:W].T                        # grid[i, g]
        t_lop = grid[:, p:p + W].T                   # grid[i, g+p]
        t_hi1 = grid[:, 1:1 + W].T                   # grid[i, g+1]
        t_hip = grid[:, p + 1:p + 1 + W].T           # grid[i, g+p+1]
        dl, dr = t_lop - t_lo, t_hip - t_hi1
        il = jnp.where(dl == 0.0, 0.0, 1.0 / jnp.where(dl == 0.0, 1.0, dl))
        ir = jnp.where(dr == 0.0, 0.0, 1.0 / jnp.where(dr == 0.0, 1.0, dr))
        w = W * I
        rec = rec.at[p - 1, 0, :w].set(il.reshape(-1))
        rec = rec.at[p - 1, 1, :w].set((-t_lo * il).reshape(-1))
        rec = rec.at[p - 1, 2, :w].set((-ir).reshape(-1))
        rec = rec.at[p - 1, 3, :w].set((t_hip * ir).reshape(-1))

    # --- fused y weights: rows [0, I) = mask*scale_base, rows I + n*I + i =
    # --- mask*scale_sp*coef; columns zero-padded to Op (128-aligned stores).
    wy = (msp[None, :, :] * jnp.transpose(coef, (2, 0, 1))).reshape(n_basis * I, O)
    wyb = jnp.pad(jnp.concatenate([msb, wy], axis=0), ((0, 0), (0, Op - O)))

    if return_aux:
        cf = jnp.transpose(coef, (2, 1, 0)).reshape(n_basis, OI)    # [n, o*I+i]
        cf = jnp.pad(cf, ((0, 0), (0, OIp - OI)))
        msb_flat = jnp.pad(msb.T.reshape(1, OI), ((0, 0), (0, OIp - OI)))
        msp_flat = jnp.pad(msp.T.reshape(1, OI), ((0, 0), (0, OIp - OI)))

    # --- generation-aware tile sizing from a per-chip VMEM budget.
    vmem_cap = _vmem_capacity_bytes()
    aux_bytes = jnp.dtype(aux_dtype).itemsize if return_aux else 0
    resident = (2 * W0I + kk * 4 * W0I + (n_basis + 1) * I * Op) * 4
    if return_aux:
        resident += (n_basis + 2) * OIp * 4
    resident *= 2                                    # pipeliner double-buffers inputs
    per_row = 2 * I * 4 + 2 * Op * 4                 # x in, y out (double-buffered)
    if return_aux:
        per_row += 2 * 2 * OIp * aux_bytes           # post, ps out
    per_row += (2 * W0I + (n_basis + 1) * I + 4 * OIp) * 4  # in-kernel live values
    budget = int(0.6 * vmem_cap)
    tb_cap = max(8, ((budget - resident) // max(per_row, 1)) // 8 * 8)
    TB = min(block_batch, tb_cap, _round_up(B, 8))
    if B >= 16:
        TB = min(TB, _round_up(-(-B // 2), 8))       # >=2 grid steps (v7x dual-TC)
    TB = max(TB, 8)
    Bp = _round_up(B, TB)
    xp = x if Bp == B else jnp.pad(x, ((0, Bp - B), (0, 0)))
    vmem_limit = int(min(vmem_cap,
                         max(resident + TB * per_row + (16 << 20), 32 << 20)))

    kernel = functools.partial(_kan_kernel, k, I, n_basis, return_aux)

    def r2(a):
        return pl.BlockSpec(a.shape, lambda bb: (0, 0))

    def r3(a):
        return pl.BlockSpec(a.shape, lambda bb: (0, 0, 0))

    in_specs = [pl.BlockSpec((TB, I), lambda bb: (bb, 0)),
                r2(glo0), r2(ghi0), r3(rec), r2(wyb)]
    operands = [xp, glo0, ghi0, rec, wyb]
    out_specs = [pl.BlockSpec((TB, Op), lambda bb: (bb, 0))]
    out_shape = [jax.ShapeDtypeStruct((Bp, Op), f32)]
    if return_aux:
        in_specs += [r2(cf), r2(msb_flat), r2(msp_flat)]
        operands += [cf, msb_flat, msp_flat]
        out_specs += [pl.BlockSpec((TB, OIp), lambda bb: (bb, 0))] * 2
        out_shape += [jax.ShapeDtypeStruct((Bp, OIp), aux_dtype)] * 2

    outs = pl.pallas_call(
        kernel,
        grid=(Bp // TB,),
        in_specs=in_specs,
        out_specs=tuple(out_specs),
        out_shape=tuple(out_shape),
        compiler_params=pltpu.CompilerParams(
            dimension_semantics=("parallel",),
            vmem_limit_bytes=vmem_limit,
        ),
    )(*operands)

    if not return_aux:
        (y_p,) = outs
        return y_p[:B, :O]

    y_p, post_p, ps_p = outs
    y = y_p[:B, :O]
    postacts = post_p[:B, :OI].reshape(B, O, I)
    postspline = ps_p[:B, :OI].reshape(B, O, I)
    preacts = jnp.broadcast_to(x[:B, None, :], (B, O, I))   # built lazily, not in-kernel
    return y, preacts, postacts, postspline


# ----------------------------------------------------------------------------
# Parameter construction (deterministic, mirrors __init__ shapes)
# ----------------------------------------------------------------------------
def extend_grid(grid, k_extend):
    h = (grid[:, -1:] - grid[:, :1]) / (grid.shape[1] - 1)
    for _ in range(k_extend):
        grid = jnp.concatenate([grid[:, :1] - h, grid], axis=1)
        grid = jnp.concatenate([grid, grid[:, -1:] + h], axis=1)
    return grid


# ----------------------------------------------------------------------------
# Pure-JAX reference (for correctness check)
# ----------------------------------------------------------------------------
def _b_batch_ref(x, grid, k):
    xe = x[:, :, None]
    ge = grid[None, :, :]
    v = jnp.logical_and(xe >= ge[:, :, :-1], xe < ge[:, :, 1:]).astype(jnp.float32)
    for p in range(1, k + 1):
        v = ((xe - ge[:, :, :-(p + 1)]) / (ge[:, :, p:-1] - ge[:, :, :-(p + 1)]) * v[:, :, :-1]
             + (ge[:, :, p + 1:] - xe) / (ge[:, :, p + 1:] - ge[:, :, 1:-p]) * v[:, :, 1:])
        v = jnp.nan_to_num(v)
    return v


def kan_forward_ref(x, grid, coef, scale_base, scale_sp, mask, k):
    bspl = _b_batch_ref(x, grid, k)                              # (B, I, N)
    y = jnp.einsum('bin,ion->bio', bspl, coef,
                   precision=jax.lax.Precision.HIGHEST)          # (B, I, O)
    postspline = jnp.transpose(y, (0, 2, 1))                     # (B, O, I)
    base = jax.nn.silu(x)
    y = scale_base[None] * base[:, :, None] + scale_sp[None] * y
    y = mask[None] * y
    postacts = jnp.transpose(y, (0, 2, 1))                       # (B, O, I)
    yy = jnp.sum(y, axis=1)                                      # (B, O)
    preacts = jnp.broadcast_to(x[:, None, :], (x.shape[0], coef.shape[1], x.shape[1]))
    return yy, preacts, postacts, postspline


# ----------------------------------------------------------------------------
if __name__ == "__main__":
    key = jax.random.PRNGKey(0)
    batch, in_dim, out_dim, num, k = 8, 4, 8, 5, 3
    grid_range = (-1.0, 1.0)

    k1, k2, k3 = jax.random.split(key, 3)
    x = jax.random.uniform(k1, (batch, in_dim), jnp.float32, -1.0, 1.0)

    # grid: (in_dim, num + 1) -> extended -> (in_dim, num + 1 + 2k)
    base_grid = jnp.broadcast_to(
        jnp.linspace(grid_range[0], grid_range[1], num + 1)[None, :],
        (in_dim, num + 1)).astype(jnp.float32)
    grid = extend_grid(base_grid, k)

    # Coefficients: PyTorch init fits noise with torch.linalg.lstsq; here we
    # only reproduce the shape/scale deterministically.
    # TODO(synk): curve2coef least-squares initialization not ported (init-only path).
    noise_scale = 0.5
    coef = (jax.random.normal(k2, (in_dim, out_dim, num + k), jnp.float32)
            * (noise_scale / num))

    scale_base_mu, scale_base_sigma, scale_sp_c = 0.0, 1.0, 1.0
    mask = jnp.ones((in_dim, out_dim), jnp.float32)
    scale_base = (scale_base_mu / jnp.sqrt(float(in_dim))
                  + scale_base_sigma
                  * (jax.random.uniform(k3, (in_dim, out_dim), jnp.float32) * 2.0 - 1.0)
                  / jnp.sqrt(float(in_dim))).astype(jnp.float32)
    scale_sp = (jnp.ones((in_dim, out_dim), jnp.float32)
                * scale_sp_c / jnp.sqrt(float(in_dim)) * mask)

    outs = kan_forward(x, grid, coef, scale_base, scale_sp, mask, k)
    outs = jax.block_until_ready(outs)

    refs = kan_forward_ref(x, grid, coef, scale_base, scale_sp, mask, k)
    names = ("y", "preacts", "postacts", "postspline")
    for name, o, r in zip(names, outs, refs):
        assert o.shape == r.shape, (name, o.shape, r.shape)
        assert jnp.allclose(o, r, atol=1e-5, rtol=1e-5), name

    # y-only fast path (no postacts/postspline/preacts writeback).
    y_fast = jax.block_until_ready(
        kan_forward(x, grid, coef, scale_base, scale_sp, mask, k, return_aux=False))
    assert y_fast.shape == refs[0].shape
    assert jnp.allclose(y_fast, refs[0], atol=1e-5, rtol=1e-5), "y_fast"

    print("KERNEL_OK")
</pallas_src>

<mosaic_0001>
module attributes {stable_mosaic.version = 11 : i64} {
  func.func @_kan_kernel(%arg0: i32, %arg1: memref<8x4xf32, #tpu.memory_space<vmem>>, %arg2: memref<1x44xf32, #tpu.memory_space<vmem>>, %arg3: memref<1x44xf32, #tpu.memory_space<vmem>>, %arg4: memref<3x4x44xf32, #tpu.memory_space<vmem>>, %arg5: memref<36x128xf32, #tpu.memory_space<vmem>>, %arg6: memref<8x128xf32, #tpu.memory_space<vmem>>, %arg7: memref<1x128xf32, #tpu.memory_space<vmem>>, %arg8: memref<1x128xf32, #tpu.memory_space<vmem>>, %arg9: memref<8x128xf32, #tpu.memory_space<vmem>>, %arg10: memref<8x128xf32, #tpu.memory_space<vmem>>, %arg11: memref<8x128xf32, #tpu.memory_space<vmem>>) attributes {dimension_semantics = [#tpu.dimension_semantics<parallel>], iteration_bounds = array<i64: 1>, scalar_prefetch = 0 : i64, scratch_operands = 0 : i64, tpu.core_type = #tpu.core_type<tc>, window_params = [{transform_indices = @transform_0, window_bounds = array<i64: 8, 4>}, {pipeline_mode = #tpu.pipeline_mode<synchronous>, transform_indices = @transform_1, window_bounds = array<i64: 1, 44>}, {pipeline_mode = #tpu.pipeline_mode<synchronous>, transform_indices = @transform_2, window_bounds = array<i64: 1, 44>}, {pipeline_mode = #tpu.pipeline_mode<synchronous>, transform_indices = @transform_3, window_bounds = array<i64: 3, 4, 44>}, {pipeline_mode = #tpu.pipeline_mode<synchronous>, transform_indices = @transform_4, window_bounds = array<i64: 36, 128>}, {pipeline_mode = #tpu.pipeline_mode<synchronous>, transform_indices = @transform_5, window_bounds = array<i64: 8, 128>}, {pipeline_mode = #tpu.pipeline_mode<synchronous>, transform_indices = @transform_6, window_bounds = array<i64: 1, 128>}, {pipeline_mode = #tpu.pipeline_mode<synchronous>, transform_indices = @transform_7, window_bounds = array<i64: 1, 128>}, {transform_indices = @transform_8, window_bounds = array<i64: 8, 128>}, {transform_indices = @transform_9, window_bounds = array<i64: 8, 128>}, {transform_indices = @transform_10, window_bounds = array<i64: 8, 128>}]} {
    %c0 = arith.constant 0 : index
    %c0_0 = arith.constant 0 : index
    %0 = vector.load %arg1[%c0, %c0_0] : memref<8x4xf32, #tpu.memory_space<vmem>>, vector<8x4xf32>
    %1 = arith.negf %0 : vector<8x4xf32>
    %2 = math.exp %1 : vector<8x4xf32>
    %cst = arith.constant 1.000000e+00 : f32
    %3 = vector.broadcast %cst : f32 to vector<8x4xf32>
    %4 = arith.addf %3, %2 : vector<8x4xf32>
    %5 = arith.divf %3, %4 : vector<8x4xf32>
    %6 = arith.mulf %0, %5 : vector<8x4xf32>
    %7 = tpu.concatenate %0, %0 in 1 : vector<8x4xf32>, vector<8x4xf32> -> vector<8x8xf32>
    %8 = tpu.concatenate %7, %7 in 1 : vector<8x8xf32>, vector<8x8xf32> -> vector<8x16xf32>
    %9 = tpu.concatenate %8, %8 in 1 : vector<8x16xf32>, vector<8x16xf32> -> vector<8x32xf32>
    %10 = vector.extract_strided_slice %9 {offsets = [0, 0], sizes = [8, 12], strides = [1, 1]} : vector<8x32xf32> to vector<8x12xf32>
    %11 = tpu.concatenate %9, %10 in 1 : vector<8x32xf32>, vector<8x12xf32> -> vector<8x44xf32>
    %c0_1 = arith.constant 0 : index
    %c0_2 = arith.constant 0 : index
    %12 = vector.load %arg2[%c0_1, %c0_2] : memref<1x44xf32, #tpu.memory_space<vmem>>, vector<1x44xf32>
    %13 = vector.broadcast %12 : vector<1x44xf32> to vector<8x44xf32>
    %14 = arith.cmpf oge, %11, %13 : vector<8x44xf32>
    %c0_3 = arith.constant 0 : index
    %c0_4 = arith.constant 0 : index
    %15 = vector.load %arg3[%c0_3, %c0_4] : memref<1x44xf32, #tpu.memory_space<vmem>>, vector<1x44xf32>
    %16 = vector.broadcast %15 : vector<1x44xf32> to vector<8x44xf32>
    %17 = arith.cmpf olt, %11, %16 : vector<8x44xf32>
    %18 = arith.andi %14, %17 : vector<8x44xi1>
    %19 = arith.extui %18 : vector<8x44xi1> to vector<8x44xi32>
    %20 = arith.sitofp %19 : vector<8x44xi32> to vector<8x44xf32>
    %21 = vector.extract_strided_slice %11 {offsets = [0, 0], sizes = [8, 40], strides = [1, 1]} : vector<8x44xf32> to vector<8x40xf32>
    %c0_5 = arith.constant 0 : index
    %c0_6 = arith.constant 0 : index
    %c0_7 = arith.constant 0 : index
    %22 = vector.load %arg4[%c0_5, %c0_6, %c0_7] : memref<3x4x44xf32, #tpu.memory_space<vmem>>, vector<1x1x40xf32>
    %23 = vector.shape_cast %22 : vector<1x1x40xf32> to vector<1x40xf32>
    %24 = vector.broadcast %23 : vector<1x40xf32> to vector<8x40xf32>
    %25 = arith.mulf %21, %24 : vector<8x40xf32>
    %c0_8 = arith.constant 0 : index
    %c1 = arith.constant 1 : index
    %c0_9 = arith.constant 0 : index
    %26 = vector.load %arg4[%c0_8, %c1, %c0_9] : memref<3x4x44xf32, #tpu.memory_space<vmem>>, vector<1x1x40xf32>
    %27 = vector.shape_cast %26 : vector<1x1x40xf32> to vector<1x40xf32>
    %28 = vector.broadcast %27 : vector<1x40xf32> to vector<8x40xf32>
    %29 = arith.addf %25, %28 : vector<8x40xf32>
    %c0_10 = arith.constant 0 : index
    %c2 = arith.constant 2 : index
    %c0_11 = arith.constant 0 : index
    %30 = vector.load %arg4[%c0_10, %c2, %c0_11] : memref<3x4x44xf32, #tpu.memory_space<vmem>>, vector<1x1x40xf32>
    %31 = vector.shape_cast %30 : vector<1x1x40xf32> to vector<1x40xf32>
    %32 = vector.broadcast %31 : vector<1x40xf32> to vector<8x40xf32>
    %33 = arith.mulf %21, %32 : vector<8x40xf32>
    %c0_12 = arith.constant 0 : index
    %c3 = arith.constant 3 : index
    %c0_13 = arith.constant 0 : index
    %34 = vector.load %arg4[%c0_12, %c3, %c0_13] : memref<3x4x44xf32, #tpu.memory_space<vmem>>, vector<1x1x40xf32>
    %35 = vector.shape_cast %34 : vector<1x1x40xf32> to vector<1x40xf32>
    %36 = vector.broadcast %35 : vector<1x40xf32> to vector<8x40xf32>
    %37 = arith.addf %33, %36 : vector<8x40xf32>
    %38 = vector.extract_strided_slice %20 {offsets = [0, 0], sizes = [8, 40], strides = [1, 1]} : vector<8x44xf32> to vector<8x40xf32>
    %39 = arith.mulf %29, %38 : vector<8x40xf32>
    %40 = vector.extract_strided_slice %20 {offsets = [0, 4], sizes = [8, 40], strides = [1, 1]} : vector<8x44xf32> to vector<8x40xf32>
    %41 = arith.mulf %37, %40 : vector<8x40xf32>
    %42 = arith.addf %39, %41 : vector<8x40xf32>
    %43 = vector.extract_strided_slice %11 {offsets = [0, 0], sizes = [8, 36], strides = [1, 1]} : vector<8x44xf32> to vector<8x36xf32>
    %c1_14 = arith.constant 1 : index
    %c0_15 = arith.constant 0 : index
    %c0_16 = arith.constant 0 : index
    %44 = vector.load %arg4[%c1_14, %c0_15, %c0_16] : memref<3x4x44xf32, #tpu.memory_space<vmem>>, vector<1x1x36xf32>
    %45 = vector.shape_cast %44 : vector<1x1x36xf32> to vector<1x36xf32>
    %46 = vector.broadcast %45 : vector<1x36xf32> to vector<8x36xf32>
    %47 = arith.mulf %43, %46 : vector<8x36xf32>
    %c1_17 = arith.constant 1 : index
    %c1_18 = arith.constant 1 : index
    %c0_19 = arith.constant 0 : index
    %48 = vector.load %arg4[%c1_17, %c1_18, %c0_19] : memref<3x4x44xf32, #tpu.memory_space<vmem>>, vector<1x1x36xf32>
    %49 = vector.shape_cast %48 : vector<1x1x36xf32> to vector<1x36xf32>
    %50 = vector.broadcast %49 : vector<1x36xf32> to vector<8x36xf32>
    %51 = arith.addf %47, %50 : vector<8x36xf32>
    %c1_20 = arith.constant 1 : index
    %c2_21 = arith.constant 2 : index
    %c0_22 = arith.constant 0 : index
    %52 = vector.load %arg4[%c1_20, %c2_21, %c0_22] : memref<3x4x44xf32, #tpu.memory_space<vmem>>, vector<1x1x36xf32>
    %53 = vector.shape_cast %52 : vector<1x1x36xf32> to vector<1x36xf32>
    %54 = vector.broadcast %53 : vector<1x36xf32> to vector<8x36xf32>
    %55 = arith.mulf %43, %54 : vector<8x36xf32>
    %c1_23 = arith.constant 1 : index
    %c3_24 = arith.constant 3 : index
    %c0_25 = arith.constant 0 : index
    %56 = vector.load %arg4[%c1_23, %c3_24, %c0_25] : memref<3x4x44xf32, #tpu.memory_space<vmem>>, vector<1x1x36xf32>
    %57 = vector.shape_cast %56 : vector<1x1x36xf32> to vector<1x36xf32>
    %58 = vector.broadcast %57 : vector<1x36xf32> to vector<8x36xf32>
    %59 = arith.addf %55, %58 : vector<8x36xf32>
    %60 = vector.extract_strided_slice %42 {offsets = [0, 0], sizes = [8, 36], strides = [1, 1]} : vector<8x40xf32> to vector<8x36xf32>
    %61 = arith.mulf %51, %60 : vector<8x36xf32>
    %62 = vector.extract_strided_slice %42 {offsets = [0, 4], sizes = [8, 36], strides = [1, 1]} : vector<8x40xf32> to vector<8x36xf32>
    %63 = arith.mulf %59, %62 : vector<8x36xf32>
    %64 = arith.addf %61, %63 : vector<8x36xf32>
    %65 = vector.extract_strided_slice %11 {offsets = [0, 0], sizes = [8, 32], strides = [1, 1]} : vector<8x44xf32> to vector<8x32xf32>
    %c2_26 = arith.constant 2 : index
    %c0_27 = arith.constant 0 : index
    %c0_28 = arith.constant 0 : index
    %66 = vector.load %arg4[%c2_26, %c0_27, %c0_28] : memref<3x4x44xf32, #tpu.memory_space<vmem>>, vector<1x1x32xf32>
    %67 = vector.shape_cast %66 : vector<1x1x32xf32> to vector<1x32xf32>
    %68 = vector.broadcast %67 : vector<1x32xf32> to vector<8x32xf32>
    %69 = arith.mulf %65, %68 : vector<8x32xf32>
    %c2_29 = arith.constant 2 : index
    %c1_30 = arith.constant 1 : index
    %c0_31 = arith.constant 0 : index
    %70 = vector.load %arg4[%c2_29, %c1_30, %c0_31] : memref<3x4x44xf32, #tpu.memory_space<vmem>>, vector<1x1x32xf32>
    %71 = vector.shape_cast %70 : vector<1x1x32xf32> to vector<1x32xf32>
    %72 = vector.broadcast %71 : vector<1x32xf32> to vector<8x32xf32>
    %73 = arith.addf %69, %72 : vector<8x32xf32>
    %c2_32 = arith.constant 2 : index
    %c2_33 = arith.constant 2 : index
    %c0_34 = arith.constant 0 : index
    %74 = vector.load %arg4[%c2_32, %c2_33, %c0_34] : memref<3x4x44xf32, #tpu.memory_space<vmem>>, vector<1x1x32xf32>
    %75 = vector.shape_cast %74 : vector<1x1x32xf32> to vector<1x32xf32>
    %76 = vector.broadcast %75 : vector<1x32xf32> to vector<8x32xf32>
    %77 = arith.mulf %65, %76 : vector<8x32xf32>
    %c2_35 = arith.constant 2 : index
    %c3_36 = arith.constant 3 : index
    %c0_37 = arith.constant 0 : index
    %78 = vector.load %arg4[%c2_35, %c3_36, %c0_37] : memref<3x4x44xf32, #tpu.memory_space<vmem>>, vector<1x1x32xf32>
    %79 = vector.shape_cast %78 : vector<1x1x32xf32> to vector<1x32xf32>
    %80 = vector.broadcast %79 : vector<1x32xf32> to vector<8x32xf32>
    %81 = arith.addf %77, %80 : vector<8x32xf32>
    %82 = vector.extract_strided_slice %64 {offsets = [0, 0], sizes = [8, 32], strides = [1, 1]} : vector<8x36xf32> to vector<8x32xf32>
    %83 = arith.mulf %73, %82 : vector<8x32xf32>
    %84 = vector.extract_strided_slice %64 {offsets = [0, 4], sizes = [8, 32], strides = [1, 1]} : vector<8x36xf32> to vector<8x32xf32>
    %85 = arith.mulf %81, %84 : vector<8x32xf32>
    %86 = arith.addf %83, %85 : vector<8x32xf32>
    %87 = tpu.concatenate %6, %86 in 1 : vector<8x4xf32>, vector<8x32xf32> -> vector<8x36xf32>
    %c0_38 = arith.constant 0 : index
    %c0_39 = arith.constant 0 : index
    %88 = vector.load %arg5[%c0_38, %c0_39] : memref<36x128xf32, #tpu.memory_space<vmem>>, vector<36x128xf32>
    %cst_40 = arith.constant dense<0.000000e+00> : vector<8x128xf32>
    %89 = tpu.matmul %87, %88, %cst_40 {dimension_numbers = #tpu.dot_dimension_numbers<[1], [0], [0], [1], [0, 0, 1, 1], [], []>, precision = #tpu.contract_precision<fp32>} : vector<8x36xf32>, vector<36x128xf32>, vector<8x128xf32> -> vector<8x128xf32>
    %c0_41 = arith.constant 0 : index
    %c0_42 = arith.constant 0 : index
    %90 = vector.load %arg9[%c0_41, %c0_42] : memref<8x128xf32, #tpu.memory_space<vmem>>, vector<8x128xf32>
    tpu.vector_store %arg9[%c0_41, %c0_42], %89 {strides = array<i32>} : memref<8x128xf32, #tpu.memory_space<vmem>>, vector<8x128xf32>,
    %cst_43 = arith.constant 0.000000e+00 : f32
    %91 = vector.broadcast %cst_43 : f32 to vector<8x128xf32>
    %92 = vector.extract_strided_slice %86 {offsets = [0, 0], sizes = [8, 4], strides = [1, 1]} : vector<8x32xf32> to vector<8x4xf32>
    %93 = tpu.concatenate %92, %92 in 1 : vector<8x4xf32>, vector<8x4xf32> -> vector<8x8xf32>
    %94 = tpu.concatenate %93, %93 in 1 : vector<8x8xf32>, vector<8x8xf32> -> vector<8x16xf32>
    %95 = tpu.concatenate %94, %94 in 1 : vector<8x16xf32>, vector<8x16xf32> -> vector<8x32xf32>
    %96 = tpu.concatenate %95, %95 in 1 : vector<8x32xf32>, vector<8x32xf32> -> vector<8x64xf32>
    %97 = tpu.concatenate %96, %96 in 1 : vector<8x64xf32>, vector<8x64xf32> -> vector<8x128xf32>
    %c0_44 = arith.constant 0 : index
    %c0_45 = arith.constant 0 : index
    %98 = vector.load %arg6[%c0_44, %c0_45] : memref<8x128xf32, #tpu.memory_space<vmem>>, vector<1x128xf32>
    %99 = vector.broadcast %98 : vector<1x128xf32> to vector<8x128xf32>
    %100 = arith.mulf %97, %99 : vector<8x128xf32>
    %101 = arith.addf %91, %100 : vector<8x128xf32>
    %102 = vector.extract_strided_slice %86 {offsets = [0, 4], sizes = [8, 4], strides = [1, 1]} : vector<8x32xf32> to vector<8x4xf32>
    %103 = tpu.concatenate %102, %102 in 1 : vector<8x4xf32>, vector<8x4xf32> -> vector<8x8xf32>
    %104 = tpu.concatenate %103, %103 in 1 : vector<8x8xf32>, vector<8x8xf32> -> vector<8x16xf32>
    %105 = tpu.concatenate %104, %104 in 1 : vector<8x16xf32>, vector<8x16xf32> -> vector<8x32xf32>
    %106 = tpu.concatenate %105, %105 in 1 : vector<8x32xf32>, vector<8x32xf32> -> vector<8x64xf32>
    %107 = tpu.concatenate %106, %106 in 1 : vector<8x64xf32>, vector<8x64xf32> -> vector<8x128xf32>
    %c1_46 = arith.constant 1 : index
    %c0_47 = arith.constant 0 : index
    %108 = vector.load %arg6[%c1_46, %c0_47] : memref<8x128xf32, #tpu.memory_space<vmem>>, vector<1x128xf32>
    %109 = vector.broadcast %108 : vector<1x128xf32> to vector<8x128xf32>
    %110 = arith.mulf %107, %109 : vector<8x128xf32>
    %111 = arith.addf %101, %110 : vector<8x128xf32>
    %112 = vector.extract_strided_slice %86 {offsets = [0, 8], sizes = [8, 4], strides = [1, 1]} : vector<8x32xf32> to vector<8x4xf32>
    %113 = tpu.concatenate %112, %112 in 1 : vector<8x4xf32>, vector<8x4xf32> -> vector<8x8xf32>
    %114 = tpu.concatenate %113, %113 in 1 : vector<8x8xf32>, vector<8x8xf32> -> vector<8x16xf32>
    %115 = tpu.concatenate %114, %114 in 1 : vector<8x16xf32>, vector<8x16xf32> -> vector<8x32xf32>
    %116 = tpu.concatenate %115, %115 in 1 : vector<8x32xf32>, vector<8x32xf32> -> vector<8x64xf32>
    %117 = tpu.concatenate %116, %116 in 1 : vector<8x64xf32>, vector<8x64xf32> -> vector<8x128xf32>
    %c2_48 = arith.constant 2 : index
    %c0_49 = arith.constant 0 : index
    %118 = vector.load %arg6[%c2_48, %c0_49] : memref<8x128xf32, #tpu.memory_space<vmem>>, vector<1x128xf32>
    %119 = vector.broadcast %118 : vector<1x128xf32> to vector<8x128xf32>
    %120 = arith.mulf %117, %119 : vector<8x128xf32>
    %121 = arith.addf %111, %120 : vector<8x128xf32>
    %122 = vector.extract_strided_slice %86 {offsets = [0, 12], sizes = [8, 4], strides = [1, 1]} : vector<8x32xf32> to vector<8x4xf32>
    %123 = tpu.concatenate %122, %122 in 1 : vector<8x4xf32>, vector<8x4xf32> -> vector<8x8xf32>
    %124 = tpu.concatenate %123, %123 in 1 : vector<8x8xf32>, vector<8x8xf32> -> vector<8x16xf32>
    %125 = tpu.concatenate %124, %124 in 1 : vector<8x16xf32>, vector<8x16xf32> -> vector<8x32xf32>
    %126 = tpu.concatenate %125, %125 in 1 : vector<8x32xf32>, vector<8x32xf32> -> vector<8x64xf32>
    %127 = tpu.concatenate %126, %126 in 1 : vector<8x64xf32>, vector<8x64xf32> -> vector<8x128xf32>
    %c3_50 = arith.constant 3 : index
    %c0_51 = arith.constant 0 : index
    %128 = vector.load %arg6[%c3_50, %c0_51] : memref<8x128xf32, #tpu.memory_space<vmem>>, vector<1x128xf32>
    %129 = vector.broadcast %128 : vector<1x128xf32> to vector<8x128xf32>
    %130 = arith.mulf %127, %129 : vector<8x128xf32>
    %131 = arith.addf %121, %130 : vector<8x128xf32>
    %132 = vector.extract_strided_slice %86 {offsets = [0, 16], sizes = [8, 4], strides = [1, 1]} : vector<8x32xf32> to vector<8x4xf32>
    %133 = tpu.concatenate %132, %132 in 1 : vector<8x4xf32>, vector<8x4xf32> -> vector<8x8xf32>
    %134 = tpu.concatenate %133, %133 in 1 : vector<8x8xf32>, vector<8x8xf32> -> vector<8x16xf32>
    %135 = tpu.concatenate %134, %134 in 1 : vector<8x16xf32>, vector<8x16xf32> -> vector<8x32xf32>
    %136 = tpu.concatenate %135, %135 in 1 : vector<8x32xf32>, vector<8x32xf32> -> vector<8x64xf32>
    %137 = tpu.concatenate %136, %136 in 1 : vector<8x64xf32>, vector<8x64xf32> -> vector<8x128xf32>
    %c4 = arith.constant 4 : index
    %c0_52 = arith.constant 0 : index
    %138 = vector.load %arg6[%c4, %c0_52] : memref<8x128xf32, #tpu.memory_space<vmem>>, vector<1x128xf32>
    %139 = vector.broadcast %138 : vector<1x128xf32> to vector<8x128xf32>
    %140 = arith.mulf %137, %139 : vector<8x128xf32>
    %141 = arith.addf %131, %140 : vector<8x128xf32>
    %142 = vector.extract_strided_slice %86 {offsets = [0, 20], sizes = [8, 4], strides = [1, 1]} : vector<8x32xf32> to vector<8x4xf32>
    %143 = tpu.concatenate %142, %142 in 1 : vector<8x4xf32>, vector<8x4xf32> -> vector<8x8xf32>
    %144 = tpu.concatenate %143, %143 in 1 : vector<8x8xf32>, vector<8x8xf32> -> vector<8x16xf32>
    %145 = tpu.concatenate %144, %144 in 1 : vector<8x16xf32>, vector<8x16xf32> -> vector<8x32xf32>
    %146 = tpu.concatenate %145, %145 in 1 : vector<8x32xf32>, vector<8x32xf32> -> vector<8x64xf32>
    %147 = tpu.concatenate %146, %146 in 1 : vector<8x64xf32>, vector<8x64xf32> -> vector<8x128xf32>
    %c5 = arith.constant 5 : index
    %c0_53 = arith.constant 0 : index
    %148 = vector.load %arg6[%c5, %c0_53] : memref<8x128xf32, #tpu.memory_space<vmem>>, vector<1x128xf32>
    %149 = vector.broadcast %148 : vector<1x128xf32> to vector<8x128xf32>
    %150 = arith.mulf %147, %149 : vector<8x128xf32>
    %151 = arith.addf %141, %150 : vector<8x128xf32>
    %152 = vector.extract_strided_slice %86 {offsets = [0, 24], sizes = [8, 4], strides = [1, 1]} : vector<8x32xf32> to vector<8x4xf32>
    %153 = tpu.concatenate %152, %152 in 1 : vector<8x4xf32>, vector<8x4xf32> -> vector<8x8xf32>
    %154 = tpu.concatenate %153, %153 in 1 : vector<8x8xf32>, vector<8x8xf32> -> vector<8x16xf32>
    %155 = tpu.concatenate %154, %154 in 1 : vector<8x16xf32>, vector<8x16xf32> -> vector<8x32xf32>
    %156 = tpu.concatenate %155, %155 in 1 : vector<8x32xf32>, vector<8x32xf32> -> vector<8x64xf32>
    %157 = tpu.concatenate %156, %156 in 1 : vector<8x64xf32>, vector<8x64xf32> -> vector<8x128xf32>
    %c6 = arith.constant 6 : index
    %c0_54 = arith.constant 0 : index
    %158 = vector.load %arg6[%c6, %c0_54] : memref<8x128xf32, #tpu.memory_space<vmem>>, vector<1x128xf32>
    %159 = vector.broadcast %158 : vector<1x128xf32> to vector<8x128xf32>
    %160 = arith.mulf %157, %159 : vector<8x128xf32>
    %161 = arith.addf %151, %160 : vector<8x128xf32>
    %162 = vector.extract_strided_slice %86 {offsets = [0, 28], sizes = [8, 4], strides = [1, 1]} : vector<8x32xf32> to vector<8x4xf32>
    %163 = tpu.concatenate %162, %162 in 1 : vector<8x4xf32>, vector<8x4xf32> -> vector<8x8xf32>
    %164 = tpu.concatenate %163, %163 in 1 : vector<8x8xf32>, vector<8x8xf32> -> vector<8x16xf32>
    %165 = tpu.concatenate %164, %164 in 1 : vector<8x16xf32>, vector<8x16xf32> -> vector<8x32xf32>
    %166 = tpu.concatenate %165, %165 in 1 : vector<8x32xf32>, vector<8x32xf32> -> vector<8x64xf32>
    %167 = tpu.concatenate %166, %166 in 1 : vector<8x64xf32>, vector<8x64xf32> -> vector<8x128xf32>
    %c7 = arith.constant 7 : index
    %c0_55 = arith.constant 0 : index
    %168 = vector.load %arg6[%c7, %c0_55] : memref<8x128xf32, #tpu.memory_space<vmem>>, vector<1x128xf32>
    %169 = vector.broadcast %168 : vector<1x128xf32> to vector<8x128xf32>
    %170 = arith.mulf %167, %169 : vector<8x128xf32>
    %171 = arith.addf %161, %170 : vector<8x128xf32>
    %172 = tpu.concatenate %6, %6 in 1 : vector<8x4xf32>, vector<8x4xf32> -> vector<8x8xf32>
    %173 = tpu.concatenate %172, %172 in 1 : vector<8x8xf32>, vector<8x8xf32> -> vector<8x16xf32>
    %174 = tpu.concatenate %173, %173 in 1 : vector<8x16xf32>, vector<8x16xf32> -> vector<8x32xf32>
    %175 = tpu.concatenate %174, %174 in 1 : vector<8x32xf32>, vector<8x32xf32> -> vector<8x64xf32>
    %176 = tpu.concatenate %175, %175 in 1 : vector<8x64xf32>, vector<8x64xf32> -> vector<8x128xf32>
    %c0_56 = arith.constant 0 : index
    %c0_57 = arith.constant 0 : index
    %177 = vector.load %arg7[%c0_56, %c0_57] : memref<1x128xf32, #tpu.memory_space<vmem>>, vector<1x128xf32>
    %178 = vector.broadcast %177 : vector<1x128xf32> to vector<8x128xf32>
    %179 = arith.mulf %176, %178 : vector<8x128xf32>
    %c0_58 = arith.constant 0 : index
    %c0_59 = arith.constant 0 : index
    %180 = vector.load %arg8[%c0_58, %c0_59] : memref<1x128xf32, #tpu.memory_space<vmem>>, vector<1x128xf32>
    %181 = vector.broadcast %180 : vector<1x128xf32> to vector<8x128xf32>
    %182 = arith.mulf %181, %171 : vector<8x128xf32>
    %183 = arith.addf %179, %182 : vector<8x128xf32>
    %c0_60 = arith.constant 0 : index
    %c0_61 = arith.constant 0 : index
    %184 = vector.load %arg11[%c0_60, %c0_61] : memref<8x128xf32, #tpu.memory_space<vmem>>, vector<8x128xf32>
    tpu.vector_store %arg11[%c0_60, %c0_61], %171 {strides = array<i32>} : memref<8x128xf32, #tpu.memory_space<vmem>>, vector<8x128xf32>,
    %c0_62 = arith.constant 0 : index
    %c0_63 = arith.constant 0 : index
    %185 = vector.load %arg10[%c0_62, %c0_63] : memref<8x128xf32, #tpu.memory_space<vmem>>, vector<8x128xf32>
    tpu.vector_store %arg10[%c0_62, %c0_63], %183 {strides = array<i32>} : memref<8x128xf32, #tpu.memory_space<vmem>>, vector<8x128xf32>,
    return
  }
  func.func @transform_0(%arg0: i32) -> (i32, i32) {
    %c0_i32 = arith.constant 0 : i32
    %c0_i32_0 = arith.constant 0 : i32
    return %arg0, %c0_i32 : i32, i32
  }
  func.func @transform_1(%arg0: i32) -> (i32, i32) {
    %c0_i32 = arith.constant 0 : i32
    %c0_i32_0 = arith.constant 0 : i32
    %c0_i32_1 = arith.constant 0 : i32
    return %c0_i32, %c0_i32_0 : i32, i32
  }
  func.func @transform_2(%arg0: i32) -> (i32, i32) {
    %c0_i32 = arith.constant 0 : i32
    %c0_i32_0 = arith.constant 0 : i32
    %c0_i32_1 = arith.constant 0 : i32
    return %c0_i32, %c0_i32_0 : i32, i32
  }
  func.func @transform_3(%arg0: i32) -> (i32, i32, i32) {
    %c0_i32 = arith.constant 0 : i32
    %c0_i32_0 = arith.constant 0 : i32
    %c0_i32_1 = arith.constant 0 : i32
    %c0_i32_2 = arith.constant 0 : i32
    return %c0_i32, %c0_i32_0, %c0_i32_1 : i32, i32, i32
  }
  func.func @transform_4(%arg0: i32) -> (i32, i32) {
    %c0_i32 = arith.constant 0 : i32
    %c0_i32_0 = arith.constant 0 : i32
    %c0_i32_1 = arith.constant 0 : i32
    return %c0_i32, %c0_i32_0 : i32, i32
  }
  func.func @transform_5(%arg0: i32) -> (i32, i32) {
    %c0_i32 = arith.constant 0 : i32
    %c0_i32_0 = arith.constant 0 : i32
    %c0_i32_1 = arith.constant 0 : i32
    return %c0_i32, %c0_i32_0 : i32, i32
  }
  func.func @transform_6(%arg0: i32) -> (i32, i32) {
    %c0_i32 = arith.constant 0 : i32
    %c0_i32_0 = arith.constant 0 : i32
    %c0_i32_1 = arith.constant 0 : i32
    return %c0_i32, %c0_i32_0 : i32, i32
  }
  func.func @transform_7(%arg0: i32) -> (i32, i32) {
    %c0_i32 = arith.constant 0 : i32
    %c0_i32_0 = arith.constant 0 : i32
    %c0_i32_1 = arith.constant 0 : i32
    return %c0_i32, %c0_i32_0 : i32, i32
  }
  func.func @transform_8(%arg0: i32) -> (i32, i32) {
    %c0_i32 = arith.constant 0 : i32
    %c0_i32_0 = arith.constant 0 : i32
    return %arg0, %c0_i32 : i32, i32
  }
  func.func @transform_9(%arg0: i32) -> (i32, i32) {
    %c0_i32 = arith.constant 0 : i32
    %c0_i32_0 = arith.constant 0 : i32
    return %arg0, %c0_i32 : i32, i32
  }
  func.func @transform_10(%arg0: i32) -> (i32, i32) {
    %c0_i32 = arith.constant 0 : i32
    %c0_i32_0 = arith.constant 0 : i32
    return %arg0, %c0_i32 : i32, i32
  }
}

</mosaic_0001>

<bundles_post_ra>
// kernel: tpu_custom_call.1
= control target key start
LH: loop header
LB: loop body
LE: loop exit
PB: predicated region body
PF: predicated region fallthrough
CT: control target
= control target key end

     0   :  { %16 = vsyncpa [#allocation3], 0  ;;  %s1770_s0 = inlined_call_operand.vmem [shape: f32[8,4], index: 0, kind: input, shape index: {}]   ;;  %s1771_s1 = inlined_call_operand.vmem [shape: f32[1,44], index: 1, kind: input, shape index: {}]   ;;  %s1772_s2 = inlined_call_operand.hbm [shape: f32[1,44], index: 2, kind: input, shape index: {}]   ;;  %s1773_s3 = inlined_call_operand.vmem [shape: f32[3,4,44], index: 3, kind: input, shape index: {}]   ;;  %s1774_s4 = inlined_call_operand.hbm [shape: f32[36,128], index: 4, kind: input, shape index: {}]   ;;  %s1775_s5 = inlined_call_operand.vmem [shape: f32[8,128], index: 5, kind: input, shape index: {}]   ;;  %s1776_s6 = inlined_call_operand.vmem [shape: f32[1,128], index: 6, kind: input, shape index: {}]   ;;  %s1777_s7 = inlined_call_operand.vmem [shape: f32[1,128], index: 7, kind: input, shape index: {}]   ;;  %s1778_s8 = inlined_call_operand.hbm [shape: f32[8,128], index: 8, kind: output, shape index: {0}]   ;;  %s1779_s9 = inlined_call_operand.hbm [shape: f32[8,128], index: 9, kind: output, shape index: {1}]   ;;  %s1780_s10 = inlined_call_operand.hbm [shape: f32[8,128], index: 10, kind: output, shape index: {2}]  }
   0x1   :  { %17 = vsyncpa [#allocation6], 0 }
   0x2   :  { %18 = vsyncpa [#allocation4], 0 }
   0x3   :  { %19 = vsyncpa [#allocation9], 0  ;;  %s1336_s13 = smov [#allocation2]   ;;  %s1337_s15 = smov [#allocation5]  }
   0x4   :  { %s30_s14 = sshll.u32 %s1336_s13, 4  ;;  %s41_s16 = sshll.u32 %s1337_s15, 4  ;;  %s31_s14 = int_to_ptr.vmem [resolvable:$true] %s30_s14  ;;  %s42_s16 = int_to_ptr.vmem [resolvable:$true] %s41_s16 }
   0x5   :  { %s1236_s17 = scalar_lea.vmem %s31_s14, 16  ;;  %s1240_s18 = scalar_lea.vmem %s31_s14, 32 }
   0x6   :  { %p1237_p0 = scmp.ne.s32.totalorder %s31_s14, %s1236_s17  ;;  %p1241_p1 = scmp.lt.s32.totalorder %s31_s14, %s31_s14 }
   0x7   :  { %p1242_p2 = scmp.lt.s32.totalorder %s1240_s18, %s1236_s17 }
   0x9   :  { %p1243_p3 = por %p1242_p2, %p1241_p1 }
   0xb   :  { %p1244_p4 = pnand %p1243_p3, %p1237_p0 }
   0xd   :  { %1247 = shalt.err (!%p1244_p4)
}
   0xe   :  { %33 = dma.hbm_to_vmem [thread:$0]  %s1772_s2, 16, %s31_s14, [#allocation3]  }
   0xf   :  { %s1256_s21 = scalar_lea.vmem %s42_s16, 640  ;;  %p1261_p6 = scmp.lt.s32.totalorder %s42_s16, %s42_s16 }
  0x10   :  { %p1257_p5 = scmp.ne.s32.totalorder %s42_s16, %s1256_s21  ;;  %p1262_p7 = scmp.lt.s32.totalorder %s1256_s21, %s1256_s21 }
  0x12   :  { %p1263_p8 = por %p1262_p7, %p1261_p6 }
  0x14   :  { %p1264_p9 = pnand %p1263_p8, %p1257_p5 }
  0x16   :  { %1267 = shalt.err (!%p1264_p9)
}
  0x17   :  { %s1338_s22 = smov 128   ;;  %s1339_s23 = smov 8  }
  0x18   :  { %47 = dma.hbm_to_vmem [thread:$0]  %s1774_s4, 640, %s42_s16, [#allocation6], %s1338_s22, %s1338_s22, %s1339_s23  }
  0x19   :  { %1328 = dma.done.wait [#allocation3], 16  }
  0x1a   :  { %1329 = vsyncadd [#allocation3], 4294967280 }
  0x1b   :  { %1330 = dma.done.wait [#allocation6], 640  }
  0x1c   :  { %1331 = vsyncadd [#allocation6], 4294966656  ;;  %v1421_v0 = vld [vmem:[%s1770_s0] sm:$0xff]  ;;  %s1340_s27 = smov 4   ;;  %vm72_vm0 = vcmask 31744   ;;  %vm78_vm1 = vcmask 64512  }
  0x1d   :  { %69 = vrot.lane.b32.xlu0 %v1421_v0, %s1340_s27  ;;  %s1341_s4 = smov 16   ;;  %v1342_v5 = vmov 0.0   ;;  %vm84_vm2 = vcmask 130048   ;;  %s1343_s0 = smov 32   ;;  %vm90_vm3 = vcmask 261120   ;;  %vm220_vm7 = vcmask 1043456  }
  0x1e   :  { %1139 = vmatprep.subr.mxu1 %v1342_v5  ;;  %1126 = vmatprep.subr.mxu0 %v1342_v5  ;;  %v1057_v8 = vld [vmem:[%s1771_s1] ss:$0 sm:$0xff]  ;;  %v1058_v9 = vld [vmem:[#allocation2] ss:$0 sm:$0xff]  ;;  %v1061_v13 = vld [vmem:[%s1773_s3 + $0x1] ss:$0 sm:$0xff] }
  0x1f   :  { %v1060_v10 = vld [vmem:[%s1773_s3] ss:$0 sm:$0xff]  ;;  %s1344_s1 = smov 124   ;;  %v1062_v18 = vld [vmem:[%s1773_s3 + $0x2] ss:$0 sm:$0xff]  ;;  %v212_v62 = vld [vmem:[#allocation5 + $0x8] sm:$0xff] }
  0x20   :  { %v1063_v20 = vld [vmem:[%s1773_s3 + $0x3] ss:$0 sm:$0xff]  ;;  %v1065_v21 = vld [vmem:[%s1773_s3 + $0x4] ss:$0 sm:$0xff]  ;;  %v1067_v25 = vld [vmem:[%s1773_s3 + $0x5] ss:$0 sm:$0xff] }
  0x21   :  { %v1069_v30 = vld [vmem:[%s1773_s3 + $0x6] ss:$0 sm:$0xff]  ;;  %v1071_v32 = vld [vmem:[%s1773_s3 + $0x7] ss:$0 sm:$0xff]  ;;  %v1073_v33 = vld [vmem:[%s1773_s3 + $0x8] ss:$0 sm:$0xff] }
  0x22   :  { %v1075_v37 = vld [vmem:[%s1773_s3 + $0x9] ss:$0 sm:$0xff]  ;;  %v215_v42 = vld [vmem:[#allocation5 + $0x20] sm:$0xf]  ;;  %v213_v44 = vld [vmem:[#allocation5 + $0x10] sm:$0xff]  ;;  %v1520_v63 = vand.u32 4294901760, %v212_v62 }
  0x23   :  { %v214_v43 = vld [vmem:[#allocation5 + $0x18] sm:$0xff]  ;;  %v222_v45 = vsel %vm220_vm7, %v215_v42, 0  ;;  %v1485_v47 = vand.u32 4294901760, %v213_v44  ;;  %v1056_v61 = vmul.f32 -1.442695, %v1421_v0  ;;  %vm1345_vm8 = vmmov 0  }
  0x24   :  { %v1483_v46 = vand.u32 4294901760, %v214_v43  ;;  %v1487_v48 = vand.u32 4294901760, %v222_v45  ;;  %1149 = vmatprep.mubr.msk.f32.mxu1 %vm1345_vm8, %v1342_v5  ;;  %1136 = vmatprep.mubr.msk.f32.mxu0 %vm1345_vm8, %v1342_v5  ;;  %s1347_s15 = smov 120   ;;  %s1348_s16 = smov 108   ;;  %vm216_vm9 = vcmask 293888  }
  0x25   :  { %v1493_v50 = vsub.f32 %v213_v44, %v1485_v47  ;;  %1224 = vpow2.f32 %v1056_v61  ;;  %s1349_s17 = smov 112   ;;  %s1350_s18 = smov 100  }
  0x26   :  { %v1490_v49 = vsub.f32 %v214_v43, %v1483_v46  ;;  %v1496_v51 = vsub.f32 %v222_v45, %v1487_v48  ;;  %1127 = vmatpush3.msra.mxu0 %v1487_v48  ;;  %s1351_s19 = smov 104  }
  0x27   :  { %v343_v53 = vand.u32 4294901760, %v1493_v50  ;;  %1128 = vmatprep.subr.mxu0 %v1342_v5 }
  0x28   :  { %v336_v52 = vand.u32 4294901760, %v1490_v49  ;;  %v329_v54 = vand.u32 4294901760, %v1496_v51  ;;  %1129 = vmatpush3.msra.mxu0 %v1483_v46 }
  0x29   :  { %1130 = vmatprep.subr.mxu0 %v1342_v5  ;;  %v344_v57 = vsub.f32 %v1493_v50, %v343_v53 }
  0x2a   :  { %v337_v55 = vsub.f32 %v1490_v49, %v336_v52  ;;  %v330_v56 = vsub.f32 %v1496_v51, %v329_v54  ;;  %1131 = vmatpush3.msra.mxu0 %v1485_v47 }
  0x2b   :  { %1132 = vmatprep.subr.mxu0 %v1342_v5  ;;  %v345_v60 = vand.u32 4294901760, %v344_v57 }
  0x2c   :  { %v331_v58 = vand.u32 4294901760, %v330_v56  ;;  %v338_v59 = vand.u32 4294901760, %v337_v55  ;;  %1133 = vmatpush3.msra.mxu0 %v1520_v63 }
  0x2d   :  { %1134 = vmatprep.subr.mxu0 %v1342_v5 }
  0x2e   :  { %1140 = vmatpush3.msra.mxu1 %v331_v58 }
  0x2f   :  { %1141 = vmatprep.subr.mxu1 %v1342_v5 }
  0x30   :  { %1142 = vmatpush3.msra.mxu1 %v338_v59 }
  0x31   :  { %1143 = vmatprep.subr.mxu1 %v1342_v5 }
  0x32   :  { %1144 = vmatpush3.msra.mxu1 %v345_v60 }
  0x33   :  { %1145 = vmatprep.subr.mxu1 %v1342_v5 }
  0x8f   :  { %v70_v1 = vpop.permute.xlu0 %69 }
  0x90   :  { %v73_v2 = vsel %vm72_vm0, %v1421_v0, %v70_v1  ;;  %v211_v1 = vld [vmem:[#allocation5] sm:$0xff] }
  0x91   :  { %75 = vrot.lane.b32.xlu0 %v73_v2, %s1339_s23 }
 0x103   :  { %v76_v3 = vpop.permute.xlu0 %75 }
 0x104   :  { %v79_v4 = vsel %vm78_vm1, %v73_v2, %v76_v3  ;;  %v1523_v2 = vsub.f32 %v212_v62, %v1520_v63  ;;  %v1525_v3 = vand.u32 4294901760, %v211_v1 }
 0x105   :  { %81 = vrot.lane.b32.xlu1 %v79_v4, %s1341_s4 }
 0x106   :  { %1135 = vmatpush3.msra.mxu0 %v1525_v3 }
 0x107   :  { %1152 = vmatprep.subr.mxu0 %v1342_v5 }
 0x177   :  { %v82_v6 = vpop.permute.xlu1 %81 }
 0x178   :  { %v85_v7 = vsel %vm84_vm2, %v79_v4, %v82_v6  ;;  %v350_v4 = vand.u32 4294901760, %v1523_v2  ;;  %v1531_v6 = vsub.f32 %v211_v1, %v1525_v3 }
 0x179   :  { %87 = vrot.lane.b32.xlu1 %v85_v7, %s1343_s0 }
 0x1eb   :  { %v88_v11 = vpop.permute.xlu1 %87 }
 0x1ec   :  { %v1441_v12 = vsel %vm90_vm3, %v85_v7, %v88_v11  ;;  %v351_v7 = vsub.f32 %v1523_v2, %v350_v4  ;;  %v1077_v11 = vld [vmem:[%s1773_s3 + $0xa] ss:$0 sm:$0xff] }
 0x1ed   :  { %vm99_vm4 = vcmp.ge.f32.partialorder %v1441_v12, %v1057_v8  ;;  %vm107_vm5 = vcmp.lt.f32.partialorder %v1441_v12, %v1058_v9  ;;  %v116_v14 = vmul.f32 %v1060_v10, %v1441_v12  ;;  %v128_v19 = vmul.f32 %v1062_v18, %v1441_v12 }
 0x1ee   :  { %vm108_vm6 = vmand %vm99_vm4, %vm107_vm5  ;;  %v148_v23 = vmul.f32 %v1065_v21, %v1441_v12  ;;  %v160_v31 = vmul.f32 %v1069_v30, %v1441_v12  ;;  %v180_v35 = vmul.f32 %v1073_v33, %v1441_v12  ;;  %v357_v8 = vand.u32 4294901760, %v1531_v6 }
 0x1ef   :  { %v1059_v15 = vsel %vm108_vm6, 1.0, %v1342_v5  ;;  %v122_v16 = vadd.f32 %v1061_v13, %v116_v14  ;;  %v134_v22 = vadd.f32 %v1063_v20, %v128_v19  ;;  %v352_v9 = vand.u32 4294901760, %v351_v7  ;;  %v1225_v14 = vpop.eup %1224 }
 0x1f0   :  { %137 = vrot.lane.b32.xlu0 %v1059_v15, %s1344_s1  ;;  %v154_v28 = vadd.f32 %v1067_v25, %v148_v23  ;;  %v166_v34 = vadd.f32 %v1071_v32, %v160_v31  ;;  %v186_v40 = vadd.f32 %v1075_v37, %v180_v35  ;;  %v358_v10 = vsub.f32 %v1531_v6, %v357_v8 }
 0x1f1   :  { %v135_v17 = vmul.f32 %v1059_v15, %v122_v16  ;;  %1146 = vmatpush3.msra.mxu1 %v352_v9  ;;  %v192_v15 = vmul.f32 %v1077_v11, %v1441_v12  ;;  %v1079_v16 = vld [vmem:[%s1773_s3 + $0xb] ss:$0 sm:$0xff]  ;;  %s1346_s3 = smov 116  }
 0x1f2   :  { %v359_v13 = vand.u32 4294901760, %v358_v10  ;;  %1147 = vmatprep.subr.mxu1 %v1342_v5 }
 0x1f3   :  { %v198_v18 = vadd.f32 %v1079_v16, %v192_v15 }
 0x1f4   :  { %1148 = vmatpush3.msra.mxu1 %v359_v13 }
 0x1f5   :  { %1165 = vmatprep.subr.mxu1 %v1342_v5 }
 0x262   :  { %v138_v24 = vpop.permute.xlu0 %137 }
 0x263   :  { %v140_v26 = vmul.f32 %v138_v24, %v134_v22 }
 0x265   :  { %v141_v27 = vadd.f32 %v140_v26, %v135_v17  ;;  %v64_v17 = vadd.f32 1.0, %v1225_v14 }
 0x267   :  { %169 = vrot.lane.b32.xlu1 %v141_v27, %s1344_s1  ;;  %v167_v29 = vmul.f32 %v154_v28, %v141_v27  ;;  %1226 = vrcp.f32 %v64_v17 }
 0x274   :  { %v1227_v21 = vpop.eup %1226 }
 0x275   :  { %v67_v22 = vmul.f32 %v1227_v21, %v1421_v0 }
 0x2d9   :  { %v170_v36 = vpop.permute.xlu1 %169 }
 0x2da   :  { %v172_v38 = vmul.f32 %v170_v36, %v166_v34 }
 0x2dc   :  { %v173_v39 = vadd.f32 %v172_v38, %v167_v29 }
 0x2de   :  { %201 = vrot.lane.b32.xlu0 %v173_v39, %s1344_s1  ;;  %v1481_v41 = vmul.f32 %v186_v40, %v173_v39 }
 0x350   :  { %v202_v19 = vpop.permute.xlu0 %201 }
 0x351   :  { %v204_v20 = vmul.f32 %v202_v19, %v198_v18 }
 0x353   :  { %v205_v12 = vadd.f32 %v204_v20, %v1481_v41 }
 0x355   :  { %752 = vrot.lane.b32.xlu0 %v205_v12, %s1344_s1  ;;  %207 = vrot.lane.b32.xlu1 %v205_v12, %s1340_s27 }
 0x359   :  { %814 = vrot.lane.b32.xlu0 %v205_v12, %s1346_s3  ;;  %783 = vrot.lane.b32.xlu1 %v205_v12, %s1347_s15 }
 0x35d   :  { %876 = vrot.lane.b32.xlu0 %v205_v12, %s1348_s16  ;;  %845 = vrot.lane.b32.xlu1 %v205_v12, %s1349_s17 }
 0x361   :  { %938 = vrot.lane.b32.xlu0 %v205_v12, %s1350_s18  ;;  %907 = vrot.lane.b32.xlu1 %v205_v12, %s1351_s19 }
 0x365   :  { %970 = vrot.lane.b32.xlu1 %v67_v22, %s1340_s27  ;;  %s1353_s27 = smov [#allocation7]  }
 0x3c7   :  { %v753_v23 = vpop.permute.xlu0 %752  ;;  %v208_v24 = vpop.permute.xlu1 %207 }
 0x3c8   :  { %v210_v25 = vsel %vm72_vm0, %v67_v22, %v208_v24  ;;  %v1562_v26 = vsel %vm72_vm0, %v205_v12, %v208_v24  ;;  %v1565_v27 = vsel %vm72_vm0, %v753_v23, %v205_v12 }
 0x3c9   :  { %v218_v28 = vsel %vm216_vm9, %v210_v25, 0  ;;  %725 = vrot.lane.b32.xlu0 %v1562_v26, %s1339_s23  ;;  %757 = vrot.lane.b32.xlu1 %v1565_v27, %s1339_s23 }
 0x3ca   :  { %v1571_v0 = vand.u32 4294901760, %v218_v28 }
 0x3cb   :  { %v815_v29 = vpop.permute.xlu0 %814  ;;  %v784_v30 = vpop.permute.xlu1 %783 }
 0x3cc   :  { %v295_v31 = vsub.f32 %v218_v28, %v1571_v0  ;;  %1150 = vmatmul.mubr.f32.vlgmr.msra.gmra.mxu1 %v1571_v0  ;;  %v1576_v32 = vsel %vm72_vm0, %v784_v30, %v753_v23  ;;  %v1579_v33 = vsel %vm72_vm0, %v815_v29, %v784_v30 }
 0x3cd   :  { %1166 = vmatpush3.msra.mxu1 %v1487_v48  ;;  %788 = vrot.lane.b32.xlu0 %v1576_v32, %s1339_s23 }
 0x3ce   :  { %819 = vrot.lane.b32.xlu1 %v1579_v33, %s1339_s23  ;;  %1167 = vmatprep.subr.mxu1 %v1342_v5  ;;  %v296_v34 = vand.u32 4294901760, %v295_v31 }
 0x3cf   :  { %1168 = vmatpush3.msra.mxu1 %v1483_v46  ;;  %v877_v35 = vpop.permute.xlu0 %876  ;;  %v846_v36 = vpop.permute.xlu1 %845  ;;  %1175 = vmatprep.mubr.msk.f32.mxu1 %vm1345_vm8, %v1342_v5 }
 0x3d0   :  { %1169 = vmatprep.subr.mxu1 %v1342_v5  ;;  %v1592_v37 = vsel %vm72_vm0, %v846_v36, %v815_v29  ;;  %v1595_v38 = vsel %vm72_vm0, %v877_v35, %v846_v36  ;;  %v297_v39 = vsub.f32 %v295_v31, %v296_v34 }
 0x3d1   :  { %1170 = vmatpush3.msra.mxu1 %v1485_v47  ;;  %850 = vrot.lane.b32.xlu0 %v1592_v37, %s1339_s23 }
 0x3d2   :  { %881 = vrot.lane.b32.xlu1 %v1595_v38, %s1339_s23  ;;  %1171 = vmatprep.subr.mxu1 %v1342_v5  ;;  %v298_v40 = vand.u32 4294901760, %v297_v39 }
 0x3d3   :  { %1172 = vmatpush3.msra.mxu1 %v1520_v63  ;;  %v939_v41 = vpop.permute.xlu0 %938  ;;  %v908_v42 = vpop.permute.xlu1 %907 }
 0x3d4   :  { %1173 = vmatprep.subr.mxu1 %v1342_v5  ;;  %1137 = vmatmul.mubr.f32.vlgmr.msra.gmra.mxu0 %v298_v40  ;;  %v1606_v43 = vsel %vm72_vm0, %v908_v42, %v877_v35  ;;  %v1609_v44 = vsel %vm72_vm0, %v939_v41, %v908_v42 }
 0x3d5   :  { %1153 = vmatpush3.msra.mxu0 %v1496_v51  ;;  %1174 = vmatpush3.msra.mxu1 %v1525_v3 }
 0x3d6   :  { %912 = vrot.lane.b32.xlu0 %v1606_v43, %s1339_s23  ;;  %943 = vrot.lane.b32.xlu1 %v1609_v44, %s1339_s23 }
 0x3d7   :  { %1154 = vmatprep.subr.mxu0 %v1342_v5  ;;  %1176 = vmatmul.mubr.f32.vlgmr.msra.gmra.mxu1 %v296_v34  ;;  %v971_v45 = vpop.permute.xlu1 %970 }
 0x3d8   :  { %1191 = vmatprep.subr.mxu1 %v1342_v5  ;;  %1155 = vmatpush3.msra.mxu0 %v1490_v49  ;;  %v973_v55 = vsel %vm72_vm0, %v67_v22, %v971_v45 }
 0x3d9   :  { %1192 = vmatpush3.msra.mxu1 %v1487_v48  ;;  %1156 = vmatprep.subr.mxu0 %v1342_v5 }
 0x3da   :  { %1193 = vmatprep.subr.mxu1 %v1342_v5  ;;  %1157 = vmatpush3.msra.mxu0 %v1493_v50 }
 0x3db   :  { %1194 = vmatpush3.msra.mxu1 %v1483_v46  ;;  %975 = vrot.lane.b32.xlu0 %v973_v55, %s1339_s23  ;;  %s1352_s23 = smov 64  }
 0x3dc   :  { %1158 = vmatprep.subr.mxu0 %v1342_v5  ;;  %1195 = vmatprep.subr.mxu1 %v1342_v5 }
 0x3dd   :  { %1159 = vmatpush3.msra.mxu0 %v1523_v2  ;;  %1196 = vmatpush3.msra.mxu1 %v1485_v47 }
 0x3de   :  { %1160 = vmatprep.subr.mxu0 %v1342_v5  ;;  %1197 = vmatprep.subr.mxu1 %v1342_v5 }
 0x3df   :  { %1161 = vmatpush3.msra.mxu0 %v1531_v6  ;;  %1162 = vmatprep.mubr.msk.f32.mxu0 %vm1345_vm8, %v1342_v5 }
 0x3e0   :  { %1198 = vmatpush3.msra.mxu1 %v1520_v63  ;;  %1163 = vmatmul.mubr.f32.vlgmr.msra.gmra.mxu0 %v295_v31 }
 0x3e1   :  { %1178 = vmatprep.subr.mxu0 %v1342_v5  ;;  %1199 = vmatprep.subr.mxu1 %v1342_v5 }
 0x3e2   :  { %1179 = vmatpush3.msra.mxu0 %v329_v54  ;;  %1200 = vmatpush3.msra.mxu1 %v1525_v3 }
 0x3e3   :  { %1201 = vmatprep.mubr.msk.f32.mxu1 %vm1345_vm8, %v1342_v5  ;;  %1180 = vmatprep.subr.mxu0 %v1342_v5 }
 0x3e4   :  { %1202 = vmatmul.mubr.f32.vlgmr.msra.gmra.mxu1 %v1571_v0  ;;  %1181 = vmatpush3.msra.mxu0 %v336_v52 }
 0x3e5   :  { %1182 = vmatprep.subr.mxu0 %v1342_v5  ;;  %1188 = vmatprep.mubr.msk.f32.mxu0 %vm1345_vm8, %v1342_v5 }
 0x3e6   :  { %1183 = vmatpush3.msra.mxu0 %v343_v53 }
 0x3e7   :  { %1184 = vmatprep.subr.mxu0 %v1342_v5 }
 0x3e8   :  { %1185 = vmatpush3.msra.mxu0 %v350_v4 }
 0x3e9   :  { %1186 = vmatprep.subr.mxu0 %v1342_v5 }
 0x3ea   :  { %1187 = vmatpush3.msra.mxu0 %v357_v8 }
 0x3eb   :  { %1189 = vmatmul.mubr.f32.vlgmr.msra.gmra.mxu0 %v1571_v0 }
 0x43b   :  { %v726_v46 = vpop.permute.xlu0 %725  ;;  %v758_v47 = vpop.permute.xlu1 %757 }
 0x43c   :  { %v728_v48 = vsel %vm78_vm1, %v1562_v26, %v726_v46  ;;  %v760_v49 = vsel %vm78_vm1, %v1565_v27, %v758_v47 }
 0x43d   :  { %730 = vrot.lane.b32.xlu1 %v728_v48, %s1341_s4  ;;  %762 = vrot.lane.b32.xlu0 %v760_v49, %s1341_s4 }
 0x43f   :  { %v789_v50 = vpop.permute.xlu0 %788 }
 0x440   :  { %v820_v51 = vpop.permute.xlu1 %819  ;;  %v791_v5 = vsel %vm78_vm1, %v1576_v32, %v789_v50 }
 0x441   :  { %793 = vrot.lane.b32.xlu1 %v791_v5, %s1341_s4  ;;  %v822_v52 = vsel %vm78_vm1, %v1579_v33, %v820_v51 }
 0x442   :  { %824 = vrot.lane.b32.xlu0 %v822_v52, %s1341_s4 }
 0x443   :  { %v851_v53 = vpop.permute.xlu0 %850 }
 0x444   :  { %v882_v54 = vpop.permute.xlu1 %881  ;;  %v853_v56 = vsel %vm78_vm1, %v1592_v37, %v851_v53 }
 0x445   :  { %855 = vrot.lane.b32.xlu1 %v853_v56, %s1341_s4  ;;  %v884_v57 = vsel %vm78_vm1, %v1595_v38, %v882_v54 }
 0x446   :  { %886 = vrot.lane.b32.xlu0 %v884_v57, %s1341_s4 }
 0x448   :  { %v913_v58 = vpop.permute.xlu0 %912  ;;  %v944_v59 = vpop.permute.xlu1 %943 }
 0x449   :  { %v915_v60 = vsel %vm78_vm1, %v1606_v43, %v913_v58  ;;  %v946_v61 = vsel %vm78_vm1, %v1609_v44, %v944_v59 }
 0x44a   :  { %917 = vrot.lane.b32.xlu1 %v915_v60, %s1341_s4  ;;  %948 = vrot.lane.b32.xlu0 %v946_v61, %s1341_s4 }
 0x44d   :  { %v976_v62 = vpop.permute.xlu0 %975 }
 0x44e   :  { %v978_v63 = vsel %vm78_vm1, %v973_v55, %v976_v62 }
 0x44f   :  { %980 = vrot.lane.b32.xlu1 %v978_v63, %s1341_s4  ;;  %s1019_s4 = sshll.u32 %s1353_s27, 4  ;;  %s1020_s4 = int_to_ptr.vmem [resolvable:$true] %s1019_s4 }
 0x450   :  { %p1273_p11 = scmp.lt.s32.totalorder %s1020_s4, %s1020_s4 }
 0x48c   :  { %v396_v1 = vpop.f32.mrf.mxu1 }
 0x48e   :  { %v1151_v2 = vpop.f32.mrf.mxu1 }
 0x494   :  { %v300_v3 = vpop.f32.mrf.mxu0 }
 0x495   :  { %v397_v10 = vadd.f32 %v396_v1, %v300_v3 }
 0x496   :  { %v1138_v4 = vpop.f32.mrf.mxu0 }
 0x497   :  { %v556_v6 = vpop.f32.mrf.mxu1 }
 0x499   :  { %v1177_v7 = vpop.f32.mrf.mxu1 }
 0x4a0   :  { %v478_v8 = vpop.f32.mrf.mxu0 }
 0x4a1   :  { %v479_v13 = vadd.f32 %v478_v8, %v397_v10 }
 0x4a2   :  { %v1164_v9 = vpop.f32.mrf.mxu0 }
 0x4a3   :  { %v557_v15 = vadd.f32 %v556_v6, %v479_v13 }
 0x4a4   :  { %v718_v11 = vpop.f32.mrf.mxu1 }
 0x4a6   :  { %v1203_v14 = vpop.f32.mrf.mxu1 }
 0x4ab   :  { %v642_v16 = vpop.f32.mrf.mxu0 }
 0x4ac   :  { %v643_v17 = vadd.f32 %v642_v16, %v557_v15 }
 0x4ad   :  { %v1190_v18 = vpop.f32.mrf.mxu0 }
 0x4ae   :  { %v719_v19 = vadd.f32 %v718_v11, %v643_v17 }
 0x4af   :  { %v763_v20 = vpop.permute.xlu0 %762  ;;  %v731_v12 = vpop.permute.xlu1 %730 }
 0x4b0   :  { %722 = vst [vmem:[#allocation7] sm:$0xff] %v719_v19  ;;  %v765_v21 = vsel %vm84_vm2, %v760_v49, %v763_v20  ;;  %v733_v22 = vsel %vm84_vm2, %v728_v48, %v731_v12 }
 0x4b1   :  { %767 = vrot.lane.b32.xlu1 %v765_v21, %s1343_s0  ;;  %735 = vrot.lane.b32.xlu0 %v733_v22, %s1343_s0 }
 0x4b3   :  { %v794_v23 = vpop.permute.xlu1 %793 }
 0x4b4   :  { %v825_v24 = vpop.permute.xlu0 %824  ;;  %v796_v25 = vsel %vm84_vm2, %v791_v5, %v794_v23 }
 0x4b5   :  { %v827_v26 = vsel %vm84_vm2, %v822_v52, %v825_v24  ;;  %798 = vrot.lane.b32.xlu0 %v796_v25, %s1343_s0 }
 0x4b6   :  { %829 = vrot.lane.b32.xlu1 %v827_v26, %s1343_s0 }
 0x4b7   :  { %v856_v27 = vpop.permute.xlu1 %855 }
 0x4b8   :  { %v887_v28 = vpop.permute.xlu0 %886  ;;  %v858_v0 = vsel %vm84_vm2, %v853_v56, %v856_v27 }
 0x4b9   :  { %v889_v29 = vsel %vm84_vm2, %v884_v57, %v887_v28  ;;  %860 = vrot.lane.b32.xlu0 %v858_v0, %s1343_s0 }
 0x4ba   :  { %891 = vrot.lane.b32.xlu1 %v889_v29, %s1343_s0 }
 0x4bc   :  { %v949_v30 = vpop.permute.xlu0 %948  ;;  %v918_v31 = vpop.permute.xlu1 %917 }
 0x4bd   :  { %v951_v32 = vsel %vm84_vm2, %v946_v61, %v949_v30  ;;  %v920_v33 = vsel %vm84_vm2, %v915_v60, %v918_v31 }
 0x4be   :  { %953 = vrot.lane.b32.xlu1 %v951_v32, %s1343_s0  ;;  %922 = vrot.lane.b32.xlu0 %v920_v33, %s1343_s0 }
 0x4c1   :  { %v981_v34 = vpop.permute.xlu1 %980 }
 0x4c2   :  { %v983_v35 = vsel %vm84_vm2, %v978_v63, %v981_v34 }
 0x4c3   :  { %985 = vrot.lane.b32.xlu0 %v983_v35, %s1343_s0  ;;  %s1268_s0 = scalar_lea.vmem %s1020_s4, 128 }
 0x4c4   :  { %p1269_p10 = scmp.ne.s32.totalorder %s1020_s4, %s1268_s0  ;;  %p1274_p12 = scmp.lt.s32.totalorder %s1268_s0, %s1268_s0 }
 0x4c6   :  { %p1275_p13 = por %p1274_p12, %p1273_p11 }
 0x4c8   :  { %p1276_p0 = pnand %p1275_p13, %p1269_p10 }
 0x523   :  { %v736_v36 = vpop.permute.xlu0 %735  ;;  %v768_v37 = vpop.permute.xlu1 %767 }
 0x524   :  { %v738_v38 = vsel %vm90_vm3, %v733_v22, %v736_v36  ;;  %v770_v39 = vsel %vm90_vm3, %v765_v21, %v768_v37 }
 0x525   :  { %740 = vrot.lane.b32.xlu1 %v738_v38, %s1352_s23  ;;  %772 = vrot.lane.b32.xlu0 %v770_v39, %s1352_s23 }
 0x527   :  { %v799_v40 = vpop.permute.xlu0 %798 }
 0x528   :  { %v830_v41 = vpop.permute.xlu1 %829  ;;  %v801_v42 = vsel %vm90_vm3, %v796_v25, %v799_v40 }
 0x529   :  { %803 = vrot.lane.b32.xlu1 %v801_v42, %s1352_s23  ;;  %v832_v43 = vsel %vm90_vm3, %v827_v26, %v830_v41 }
 0x52a   :  { %834 = vrot.lane.b32.xlu0 %v832_v43, %s1352_s23 }
 0x52b   :  { %v861_v44 = vpop.permute.xlu0 %860 }
 0x52c   :  { %v892_v45 = vpop.permute.xlu1 %891  ;;  %v863_v55 = vsel %vm90_vm3, %v858_v0, %v861_v44 }
 0x52d   :  { %865 = vrot.lane.b32.xlu1 %v863_v55, %s1352_s23  ;;  %v894_v46 = vsel %vm90_vm3, %v889_v29, %v892_v45 }
 0x52e   :  { %896 = vrot.lane.b32.xlu0 %v894_v46, %s1352_s23 }
 0x530   :  { %v923_v47 = vpop.permute.xlu0 %922  ;;  %v954_v48 = vpop.permute.xlu1 %953 }
 0x531   :  { %v925_v49 = vsel %vm90_vm3, %v920_v33, %v923_v47  ;;  %v956_v50 = vsel %vm90_vm3, %v951_v32, %v954_v48 }
 0x532   :  { %927 = vrot.lane.b32.xlu1 %v925_v49, %s1352_s23  ;;  %958 = vrot.lane.b32.xlu0 %v956_v50, %s1352_s23 }
 0x533   :  { %1279 = shalt.err (!%p1276_p0)
}
 0x534   :  { %1022 = dma.vmem_to_hbm [thread:$0]  %s1020_s4, 128, %s1778_s8, [#allocation4]   ;;  %vm743_vm10 = vcmask 523264   ;;  %v1081_v52 = vld [vmem:[%s1775_s5 + $0x1] ss:$0 sm:$0xff] }
 0x535   :  { %v986_v51 = vpop.permute.xlu0 %985  ;;  %v1080_v53 = vld [vmem:[%s1775_s5] ss:$0 sm:$0xff]  ;;  %v1082_v61 = vld [vmem:[%s1775_s5 + $0x2] ss:$0 sm:$0xff]  ;;  %v1083_v63 = vld [vmem:[%s1775_s5 + $0x3] ss:$0 sm:$0xff] }
 0x536   :  { %v988_v5 = vsel %vm90_vm3, %v983_v35, %v986_v51  ;;  %v1084_v7 = vld [vmem:[%s1775_s5 + $0x4] ss:$0 sm:$0xff]  ;;  %v1085_v11 = vld [vmem:[%s1775_s5 + $0x5] ss:$0 sm:$0xff]  ;;  %v1086_v20 = vld [vmem:[%s1775_s5 + $0x6] ss:$0 sm:$0xff] }
 0x537   :  { %990 = vrot.lane.b32.xlu1 %v988_v5, %s1352_s23  ;;  %v1087_v22 = vld [vmem:[%s1775_s5 + $0x7] ss:$0 sm:$0xff]  ;;  %v1088_v0 = vld [vmem:[%s1776_s6] ss:$0 sm:$0xff]  ;;  %s1354_s5 = smov [#allocation8]   ;;  %s1355_s27 = smov [#allocation10]  }
 0x538   :  { %v1089_v30 = vld [vmem:[%s1777_s7] ss:$0 sm:$0xff]  ;;  %s1029_s23 = sshll.u32 %s1354_s5, 4  ;;  %s1039_s4 = sshll.u32 %s1355_s27, 4  ;;  %s1030_s23 = int_to_ptr.vmem [resolvable:$true] %s1029_s23  ;;  %s1040_s4 = int_to_ptr.vmem [resolvable:$true] %s1039_s4 }
 0x539   :  { %s1288_s6 = scalar_lea.vmem %s1030_s23, 128  ;;  %p1293_p2 = scmp.lt.s32.totalorder %s1030_s23, %s1030_s23 }
 0x53a   :  { %p1289_p1 = scmp.ne.s32.totalorder %s1030_s23, %s1288_s6  ;;  %p1294_p3 = scmp.lt.s32.totalorder %s1288_s6, %s1288_s6 }
 0x53c   :  { %p1295_p4 = por %p1294_p3, %p1293_p2 }
 0x53e   :  { %p1296_p5 = pnand %p1295_p4, %p1289_p1 }
 0x597   :  { %v773_v54 = vpop.permute.xlu0 %772  ;;  %v741_v56 = vpop.permute.xlu1 %740 }
 0x598   :  { %v775_v57 = vsel %vm743_vm10, %v770_v39, %v773_v54  ;;  %v744_v58 = vsel %vm743_vm10, %v738_v38, %v741_v56 }
 0x599   :  { %v781_v59 = vmul.f32 %v1081_v52, %v775_v57  ;;  %v750_v60 = vmul.f32 %v1080_v53, %v744_v58 }
 0x59b   :  { %v804_v62 = vpop.permute.xlu1 %803  ;;  %v782_v3 = vadd.f32 %v781_v59, %v750_v60 }
 0x59c   :  { %v835_v1 = vpop.permute.xlu0 %834  ;;  %v806_v2 = vsel %vm743_vm10, %v801_v42, %v804_v62 }
 0x59d   :  { %v837_v4 = vsel %vm743_vm10, %v832_v43, %v835_v1  ;;  %v812_v6 = vmul.f32 %v1082_v61, %v806_v2 }
 0x59e   :  { %v843_v8 = vmul.f32 %v1083_v63, %v837_v4 }
 0x59f   :  { %v813_v9 = vadd.f32 %v812_v6, %v782_v3  ;;  %v866_v10 = vpop.permute.xlu1 %865 }
 0x5a0   :  { %v897_v13 = vpop.permute.xlu0 %896  ;;  %v868_v14 = vsel %vm743_vm10, %v863_v55, %v866_v10 }
 0x5a1   :  { %v899_v15 = vsel %vm743_vm10, %v894_v46, %v897_v13  ;;  %v844_v16 = vadd.f32 %v843_v8, %v813_v9  ;;  %v874_v17 = vmul.f32 %v1084_v7, %v868_v14 }
 0x5a2   :  { %v905_v18 = vmul.f32 %v1085_v11, %v899_v15 }
 0x5a3   :  { %v875_v19 = vadd.f32 %v874_v17, %v844_v16 }
 0x5a4   :  { %v959_v12 = vpop.permute.xlu0 %958  ;;  %v928_v21 = vpop.permute.xlu1 %927 }
 0x5a5   :  { %v961_v23 = vsel %vm743_vm10, %v956_v50, %v959_v12  ;;  %v906_v24 = vadd.f32 %v905_v18, %v875_v19  ;;  %v930_v25 = vsel %vm743_vm10, %v925_v49, %v928_v21 }
 0x5a6   :  { %v936_v26 = vmul.f32 %v1086_v20, %v930_v25  ;;  %v967_v27 = vmul.f32 %v1087_v22, %v961_v23 }
 0x5a8   :  { %v937_v28 = vadd.f32 %v936_v26, %v906_v24 }
 0x5a9   :  { %v991_v29 = vpop.permute.xlu1 %990 }
 0x5aa   :  { %v968_v31 = vadd.f32 %v967_v27, %v937_v28  ;;  %v993_v32 = vsel %vm743_vm10, %v988_v5, %v991_v29 }
 0x5ab   :  { %v1001_v33 = vmul.f32 %v1088_v0, %v993_v32 }
 0x5ac   :  { %1011 = vst [vmem:[#allocation10] sm:$0xff] %v968_v31  ;;  %v1009_v34 = vmul.f32 %v1089_v30, %v968_v31 }
 0x5ae   :  { %v1010_v35 = vadd.f32 %v1009_v34, %v1001_v33 }
 0x5b0   :  { %1012 = vst [vmem:[#allocation8] sm:$0xff] %v1010_v35 }
 0x5b1   :  { %1299 = shalt.err (!%p1296_p5)
}
 0x5b2   :  { %1032 = dma.vmem_to_hbm [thread:$0]  %s1030_s23, 128, %s1779_s9, [#allocation9]  }
 0x5b3   :  { %s1308_s1 = scalar_lea.vmem %s1040_s4, 128  ;;  %p1313_p7 = scmp.lt.s32.totalorder %s1040_s4, %s1040_s4 }
 0x5b4   :  { %p1309_p6 = scmp.ne.s32.totalorder %s1040_s4, %s1308_s1  ;;  %p1314_p8 = scmp.lt.s32.totalorder %s1308_s1, %s1308_s1 }
 0x5b6   :  { %p1315_p9 = por %p1314_p8, %p1313_p7 }
 0x5b8   :  { %p1316_p10 = pnand %p1315_p9, %p1309_p6 }
 0x5ba   :  { %1319 = shalt.err (!%p1316_p10)
}
 0x5bb   :  { %1042 = dma.vmem_to_hbm [thread:$0]  %s1040_s4, 128, %s1780_s10, [#allocation9]  }
 0x5bc   :  { %1332 = dma.done.wait [#allocation4], 128  }
 0x5bd   :  { %1333 = vsyncadd [#allocation4], 4294967168 }
 0x5be   :  { %1334 = dma.done.wait [#allocation9], 256  }
 0x5bf   :  { %1335 = vsyncadd [#allocation9], 4294967040 }
 0x5c0   :  { %1052 = vsyncpa [#allocation3], 1 }
 0x5c1   :  { %1053 = vsyncpa [#allocation6], 1 }
 0x5c2   :  { %1054 = vsyncpa [#allocation4], 1 }
 0x5c3   :  { %1055 = vsyncpa [#allocation9], 1 }

</bundles_post_ra>
